<compile_context>
chip_gen: v7x
topology: tpu7x:2x2x1
jax: 0.10.0
libtpu: 0.0.40
codegen_flags: <defaults>
</compile_context>

<pallas_src>
import math

import jax
import jax.numpy as jnp
from jax.experimental import pallas as pl
from jax.experimental.pallas import tpu as pltpu


def _gcn_kernel(s_ref, x_ref, w_ref, b_ref, o_ref):
    # relu(s * (x_packed @ blockdiag(W^T)) + b_tiled); s = sum(adj), read from SMEM.
    y = jnp.dot(x_ref[...], w_ref[...], preferred_element_type=jnp.float32)
    y = y * s_ref[0, 0] + b_ref[...]
    o_ref[...] = jnp.maximum(y, 0.0).astype(o_ref.dtype)


def _pick_row_tile(mp, k, nout, itemsize, resident_bytes,
                   vmem_budget_bytes=12 << 20, min_steps=4):
    """Row tile: dtype-aware sublane multiple, fits a conservative VMEM budget
    (resident weight/bias accounted for), and keeps >= min_steps grid steps so the
    pipeline always overlaps DMA with compute (and v7x can use both TensorCores)."""
    sub = max(8, 32 // itemsize)                      # 8 f32 / 16 bf16 / 32 int8,fp8
    per_row = 2 * (k + nout) * itemsize               # double-buffered x-in + out tile
    avail = max(vmem_budget_bytes - resident_bytes, per_row * sub)
    cap = max(sub, avail // per_row)                  # VMEM-limited row cap
    target = max(sub, pl.cdiv(mp, min_steps))         # keep >= min_steps grid steps
    tm = max(sub, min(cap, target))
    return max(sub, (tm // sub) * sub)


def graph_convolution(x, adj, weight, bias):
    """x:(B,T,N,C) adj:(N,N) weight:(F,C) bias:(F,) -> relu(sum(adj)*x @ W^T + b)."""
    B, T, N, C = x.shape
    F = weight.shape[0]
    M = B * T * N
    dtype = x.dtype
    itemsize = jnp.dtype(dtype).itemsize

    # ---- scalar fold: einsum('ij,bnc->bnc', adj, x) == sum(adj) * x -------------
    s_arr = jnp.sum(adj).astype(jnp.float32).reshape(1, 1)        # SMEM scalar

    # ---- lane-dense packing: P rows per packed row, K = lcm(C, 128) -------------
    P = 128 // math.gcd(C, 128)                                   # P divides 128
    K = P * C                                                     # multiple of 128
    lane_q = 128 // P
    Fp = pl.cdiv(F, lane_q) * lane_q                              # P*Fp % 128 == 0
    Nout = P * Fp

    # Pad rows to a multiple of P so packing never falls back to lane-sparse layout.
    Mpk = pl.cdiv(M, P) * P
    x_flat = x.reshape(M, C)
    if Mpk != M:
        x_flat = jnp.pad(x_flat, ((0, Mpk - M), (0, 0)))
    Mp = Mpk // P
    x2d = x_flat.reshape(Mp, K)

    # Pad output features so the packed output width is a 128-multiple (no vst.msk).
    w_p, b_p = weight, bias
    if Fp != F:
        w_p = jnp.pad(weight, ((0, Fp - F), (0, 0)))
        b_p = jnp.pad(bias, ((0, Fp - F),))
    # block-diagonal diag(W^T, ..., W^T): (K, Nout); unscaled (s applied in-kernel)
    w_bd = jnp.kron(jnp.eye(P, dtype=jnp.float32),
                    w_p.T.astype(jnp.float32)).astype(dtype)
    b2d = jnp.tile(b_p.astype(jnp.float32), P).reshape(1, Nout)   # keep f32 bias

    # ---- tiling: dtype-aware, pipelined, VMEM-accounted --------------------------
    resident = K * Nout * itemsize + Nout * 4        # single-buffered weight + f32 bias
    tm = _pick_row_tile(Mp, K, Nout, itemsize, resident)
    Mp_pad = pl.cdiv(Mp, tm) * tm
    if Mp_pad != Mp:
        x2d = jnp.pad(x2d, ((0, Mp_pad - Mp), (0, 0)))
    grid = (Mp_pad // tm,)

    footprint = 2 * tm * (K + Nout) * itemsize + resident
    vmem_limit = max(int(footprint) + (4 << 20), 16 << 20)        # + compiler headroom

    out2d = pl.pallas_call(
        _gcn_kernel,
        out_shape=jax.ShapeDtypeStruct((Mp_pad, Nout), dtype),
        grid_spec=pltpu.PrefetchScalarGridSpec(
            num_scalar_prefetch=0,
            grid=grid,
            in_specs=[
                pl.BlockSpec(memory_space=pltpu.MemorySpace.SMEM),   # s = sum(adj)
                pl.BlockSpec((tm, K), lambda i: (i, 0)),             # packed x row tile
                pl.BlockSpec((K, Nout), lambda i: (0, 0),
                             pipeline_mode=pl.Buffered(1)),          # resident weight
                pl.BlockSpec((1, Nout), lambda i: (0, 0),
                             pipeline_mode=pl.Buffered(1)),          # resident f32 bias
            ],
            out_specs=pl.BlockSpec((tm, Nout), lambda i: (i, 0)),
        ),
        compiler_params=pltpu.CompilerParams(
            dimension_semantics=("parallel",),
            vmem_limit_bytes=vmem_limit),
    )(s_arr, x2d, w_bd, b2d)

    out = out2d.reshape(Mp_pad * P, Fp)[:M, :F]
    return out.reshape(B, T, N, F)


if __name__ == "__main__":
    key = jax.random.PRNGKey(0)
    k_x, k_w, k_b = jax.random.split(key, 3)

    # Small shapes consistent with the module: B=2, T=8, N=16 keypoints,
    # in_features C=32, out_features F=32.
    B, T, N, C, F = 2, 8, 16, 32, 32

    x = jax.random.normal(k_x, (B, T, N, C), dtype=jnp.float32)

    # Deterministic symmetric keypoint adjacency (chain + self loops).
    eye = jnp.eye(N, dtype=jnp.float32)
    chain = jnp.eye(N, k=1, dtype=jnp.float32) + jnp.eye(N, k=-1, dtype=jnp.float32)
    adj = eye + chain

    # nn.Linear-style deterministic init: U(-1/sqrt(C), 1/sqrt(C)).
    bound = 1.0 / jnp.sqrt(jnp.float32(C))
    weight = jax.random.uniform(k_w, (F, C), minval=-bound, maxval=bound,
                                dtype=jnp.float32)
    bias = jax.random.uniform(k_b, (F,), minval=-bound, maxval=bound,
                              dtype=jnp.float32)

    out = graph_convolution(x, adj, weight, bias)
    out = jax.block_until_ready(out)

    # Pure-JAX reference (same math as the PyTorch forward).
    ref = jax.nn.relu((jnp.sum(adj) * x) @ weight.T + bias)
    assert out.shape == (B, T, N, F)
    assert jnp.allclose(out, ref, atol=1e-4, rtol=1e-4)

    print("KERNEL_OK")
</pallas_src>

<mosaic_0001>
module attributes {stable_mosaic.version = 11 : i64} {
  func.func @_gcn_kernel(%arg0: i32, %arg1: memref<1x1xf32, #tpu.memory_space<smem>>, %arg2: memref<16x128xf32, #tpu.memory_space<vmem>>, %arg3: memref<128x128xf32, #tpu.memory_space<vmem>>, %arg4: memref<1x128xf32, #tpu.memory_space<vmem>>, %arg5: memref<16x128xf32, #tpu.memory_space<vmem>>) attributes {dimension_semantics = [#tpu.dimension_semantics<parallel>], iteration_bounds = array<i64: 4>, scalar_prefetch = 0 : i64, scratch_operands = 0 : i64, tpu.core_type = #tpu.core_type<tc>, window_params = [{transform_indices = @transform_0, window_bounds = array<i64: 1, 1>}, {transform_indices = @transform_1, window_bounds = array<i64: 16, 128>}, {pipeline_mode = #tpu.pipeline_mode<synchronous>, transform_indices = @transform_2, window_bounds = array<i64: 128, 128>}, {pipeline_mode = #tpu.pipeline_mode<synchronous>, transform_indices = @transform_3, window_bounds = array<i64: 1, 128>}, {transform_indices = @transform_4, window_bounds = array<i64: 16, 128>}]} {
    %c0 = arith.constant 0 : index
    %c0_0 = arith.constant 0 : index
    %0 = vector.load %arg2[%c0, %c0_0] : memref<16x128xf32, #tpu.memory_space<vmem>>, vector<16x128xf32>
    %c0_1 = arith.constant 0 : index
    %c0_2 = arith.constant 0 : index
    %1 = vector.load %arg3[%c0_1, %c0_2] : memref<128x128xf32, #tpu.memory_space<vmem>>, vector<128x128xf32>
    %cst = arith.constant dense<0.000000e+00> : vector<16x128xf32>
    %2 = tpu.matmul %0, %1, %cst {dimension_numbers = #tpu.dot_dimension_numbers<[1], [0], [0], [1], [0, 0, 1, 1], [], []>} : vector<16x128xf32>, vector<128x128xf32>, vector<16x128xf32> -> vector<16x128xf32>
    %c0_3 = arith.constant 0 : index
    %c0_4 = arith.constant 0 : index
    %3 = memref.load %arg1[%c0_3, %c0_4] : memref<1x1xf32, #tpu.memory_space<smem>>
    %4 = vector.broadcast %3 : f32 to vector<16x128xf32>
    %5 = arith.mulf %2, %4 : vector<16x128xf32>
    %c0_5 = arith.constant 0 : index
    %c0_6 = arith.constant 0 : index
    %6 = vector.load %arg4[%c0_5, %c0_6] : memref<1x128xf32, #tpu.memory_space<vmem>>, vector<1x128xf32>
    %7 = vector.broadcast %6 : vector<1x128xf32> to vector<16x128xf32>
    %8 = arith.addf %5, %7 : vector<16x128xf32>
    %cst_7 = arith.constant 0.000000e+00 : f32
    %9 = vector.broadcast %cst_7 : f32 to vector<16x128xf32>
    %10 = arith.maximumf %8, %9 : vector<16x128xf32>
    %c0_8 = arith.constant 0 : index
    %c0_9 = arith.constant 0 : index
    %11 = vector.load %arg5[%c0_8, %c0_9] : memref<16x128xf32, #tpu.memory_space<vmem>>, vector<16x128xf32>
    tpu.vector_store %arg5[%c0_8, %c0_9], %10 {strides = array<i32>} : memref<16x128xf32, #tpu.memory_space<vmem>>, vector<16x128xf32>,
    return
  }
  func.func @transform_0(%arg0: i32) -> (i32, i32) {
    %c0_i32 = arith.constant 0 : i32
    %c0_i32_0 = arith.constant 0 : i32
    %c0_i32_1 = arith.constant 0 : i32
    return %c0_i32, %c0_i32_0 : i32, i32
  }
  func.func @transform_1(%arg0: i32) -> (i32, i32) {
    %c0_i32 = arith.constant 0 : i32
    %c0_i32_0 = arith.constant 0 : i32
    return %arg0, %c0_i32 : i32, i32
  }
  func.func @transform_2(%arg0: i32) -> (i32, i32) {
    %c0_i32 = arith.constant 0 : i32
    %c0_i32_0 = arith.constant 0 : i32
    %c0_i32_1 = arith.constant 0 : i32
    return %c0_i32, %c0_i32_0 : i32, i32
  }
  func.func @transform_3(%arg0: i32) -> (i32, i32) {
    %c0_i32 = arith.constant 0 : i32
    %c0_i32_0 = arith.constant 0 : i32
    %c0_i32_1 = arith.constant 0 : i32
    return %c0_i32, %c0_i32_0 : i32, i32
  }
  func.func @transform_4(%arg0: i32) -> (i32, i32) {
    %c0_i32 = arith.constant 0 : i32
    %c0_i32_0 = arith.constant 0 : i32
    return %arg0, %c0_i32 : i32, i32
  }
}

</mosaic_0001>

<bundles_post_ra>
// kernel: tpu_custom_call.1
= control target key start
LH: loop header
LB: loop body
LE: loop exit
PB: predicated region body
PF: predicated region fallthrough
CT: control target
= control target key end

     0   :  { %s980_s0 = inlined_call_operand.<no memory space> [shape: f32[1,1], index: 0, kind: input, shape index: {}]   ;;  %s981_s1 = inlined_call_operand.hbm [shape: f32[64,128], index: 1, kind: input, shape index: {}]   ;;  %s982_s2 = inlined_call_operand.hbm [shape: f32[128,128], index: 2, kind: input, shape index: {}]   ;;  %s983_s3 = inlined_call_operand.vmem [shape: f32[1,128], index: 3, kind: input, shape index: {}]   ;;  %s984_s4 = inlined_call_operand.hbm [shape: f32[64,128], index: 4, kind: output, shape index: {}]  }
   0x1   :  { %9 = sst [smem:[#allocation2]] %s980_s0 }
   0x2   :  { %10 = vsyncpa [#allocation4], 0 }
   0x3   :  { %12 = vsyncpa [#allocation4 + $0x1], 0 }
   0x4   :  { %13 = vsyncpa [#allocation7], 0 }
   0x5   :  { %14 = vsyncpa [#allocation5], 0 }
   0x6   :  { %16 = vsyncpa [#allocation5 + $0x1], 0  ;;  %s771_s17 = smov 0   ;;  %s773_s18 = smov 0  }
   0x7   :  { %s775_s19 = smov 0   ;;  %s777_s20 = smov 0  }
   0x8 LB: > { %s792_s0 = sadd.s32 4294967295, %s734_s20   ;;  %s441_s21 = sadd.s32 4294967294, %s734_s20   ;;  %s734_s20 = sphi %s777_s20, %s1003_s20   ;;  %s730_s19 = sphi %s775_s19, %s1002_s19   ;;  %s726_s18 = sphi %s773_s18, %s1001_s18   ;;  %s722_s17 = sphi %s771_s17, %s1000_s17  }
   0x9   : > { %p63_p0 = scmp.ne.s32.totalorder %s726_s18, %s722_s17  ;;  %p985_p1 = scmp.eq.s32.totalorder %s792_s0, 0 }
   0xa   : > { %p135_p3 = scmp.eq.s32.totalorder %s441_s21, 3  ;;  %p442_p5 = scmp.ge.s32.totalorder %s734_s20, 1 }
   0xb   : > { %p801_p4 = por %p985_p1, %p63_p0  ;;  %p142_p7 = scmp.lt.s32.totalorder %s734_s20, 5 }
   0xc   : > { %p806_p6 = por %p135_p3, %p63_p0  ;;  %s736_s25 = smov [#allocation6]  }
   0xd   : > { %s988_s22 = scalar_select %p801_p4, 1, 0 }
   0xe   : > { %s989_s23 = scalar_select %p806_p6, 1, 0 }
   0xf   : > { %p811_p8 = pnand %p442_p5, %p142_p7  ;;  %s157_s26 = sshll.u32 %s736_s25, 4  ;;  %s158_s26 = int_to_ptr.vmem [resolvable:$true] %s157_s26 }
  0x10   : > { %s824_s28 = sadd.s32 1, %s734_s20   ;;  %s50_s29 = sadd.s32 1, %s730_s19 }
  0x11   : > { %s990_s24 = scalar_select %p811_p8, 1, 0 }
  0x12   : > { %p553_p9 = pneg %p811_p8  ;;  %s47_s30 = ssub.s32 %s734_s20, %s824_s28 }
  0x13   : > { %s606_s7 = scalar_lea.hbm %s982_s2, 2048 }
  0x14   : > { %p819_p10 = pnand %p553_p9, %p985_p1  ;;  %p607_p11 = scmp.ne.s32.totalorder %s982_s2, %s606_s7 }
  0x15   : > { %p613_p3 = scmp.lt.u32.totalorder %s606_s7, %s982_s2 }
  0x16   : > { %p608_p12 = pneg %p819_p10 }
  0x18   : > { %p609_p13 = pnand %p608_p12, %p607_p11 }
  0x1a   : > { %p610_p0 = pneg %p609_p13 }
  0x1c   : > { %p615_p5 = pnand %p613_p3, %p610_p0 }
  0x1e   : > { %618 = shalt.err (!%p615_p5)
}
  0x1f   : > { %s619_s12 = scalar_lea.vmem %s158_s26, 2048  ;;  %p627_p2 = scmp.lt.s32.totalorder %s158_s26, %s158_s26 }
  0x20   : > { %p620_p7 = scmp.ne.s32.totalorder %s158_s26, %s619_s12  ;;  %p628_p6 = scmp.lt.s32.totalorder %s619_s12, %s619_s12 }
  0x22   : > { %p622_p9 = pnand %p620_p7, %p608_p12  ;;  %p629_p4 = por %p628_p6, %p627_p2 }
  0x24   : > { %p623_p1 = pneg %p622_p9 }
  0x26   : > { %p630_p8 = pnand %p629_p4, %p623_p1 }
  0x28   : > { %633 = shalt.err (!%p630_p8)
}
  0x29   : > { %s737_s13 = smov 128   ;;  %s738_s14 = smov 8  }
  0x2a   : > { %556 = dma.hbm_to_vmem [thread:$0]  (!%p819_p10), %s982_s2, 2048, %s158_s26, [#allocation7], %s737_s13, %s737_s13, %s738_s14  }
  0x2b   : > { %p48_p1 = scmp.eq.s32.totalorder %s47_s30, 0  ;;  %p57_p2 = scmp.ne.s32.totalorder %s730_s19, %s726_s18 }
  0x2c   : > { %p58_p4 = scmp.eq.s32.totalorder %s734_s20, 0  ;;  %p566_p6 = scmp.lt.s32.totalorder %s734_s20, 4 }
  0x2d   : > { %s853_s21 = scalar_select %p48_p1, %s730_s19, %s50_s29  }
  0x2e   : > { %p59_p8 = por %p58_p4, %p57_p2  ;;  %p992_p11 = scmp.eq.s32.totalorder %s792_s0, 3 }
  0x2f   : > { %s174_s27 = sand.u32 1, %s730_s19   ;;  %s458_s5 = sshll.u32 %s734_s20, 8 }
  0x30   : > { %p857_p12 = por %p992_p11, %p57_p2  ;;  %s445_s6 = sshll.u32 %s174_s27, 4 }
  0x31   : > { %s866_s9 = scalar_lea.hbm %s981_s1, %s458_s5  ;;  %s178_s26 = scalar_lea.vmem [#allocation3], %s445_s6 }
  0x32   : > { %s185_s29 = sshll.u32 %s178_s26, 4  ;;  %p868_p10 = pnand %p566_p6, %p59_p8  ;;  %s872_s29 = int_to_ptr.vmem [resolvable:$true] %s185_s29 }
  0x33   : > { %s874_s10 = scalar_lea.sflag [#allocation4], %s174_s27  ;;  %s634_s11 = scalar_lea.hbm %s866_s9, 256 }
  0x34   : > { %p635_p13 = scmp.ne.s32.totalorder %s866_s9, %s634_s11  ;;  %p636_p0 = pneg %p868_p10 }
  0x35   : > { %s639_s16 = scalar_lea.hbm %s981_s1, 1024  ;;  %p640_p7 = scmp.lt.u32.totalorder %s866_s9, %s981_s1 }
  0x36   : > { %p637_p3 = pnand %p636_p0, %p635_p13  ;;  %p641_p9 = scmp.lt.u32.totalorder %s639_s16, %s634_s11 }
  0x37   : > { %p643_p2 = scmp.lt.u32.totalorder %s634_s11, %s866_s9 }
  0x38   : > { %p638_p5 = pneg %p637_p3  ;;  %p642_p1 = por %p641_p9, %p640_p7 }
  0x3a   : > { %p644_p4 = por %p643_p2, %p642_p1 }
  0x3c   : > { %p645_p6 = pnand %p644_p4, %p638_p5 }
  0x3e   : > { %648 = shalt.err (!%p645_p6)
}
  0x3f   : > { %s649_s27 = scalar_lea.vmem %s872_s29, 256  ;;  %s739_s7 = smov [#allocation3]  }
  0x40   : > { %p650_p8 = scmp.ne.s32.totalorder %s872_s29, %s649_s27  ;;  %s654_s8 = sshll.u32 %s739_s7, 4  ;;  %s655_s8 = int_to_ptr.vmem [resolvable:$false] %s654_s8 }
  0x41   : > { %s656_s26 = scalar_lea.vmem %s655_s8, 512  ;;  %p657_p3 = scmp.lt.s32.totalorder %s872_s29, %s655_s8 }
  0x42   : > { %p652_p11 = pnand %p650_p8, %p636_p0  ;;  %p658_p7 = scmp.lt.s32.totalorder %s656_s26, %s649_s27 }
  0x44   : > { %p653_p13 = pneg %p652_p11  ;;  %p659_p9 = por %p658_p7, %p657_p3 }
  0x46   : > { %p660_p1 = pnand %p659_p9, %p653_p13 }
  0x48   : > { %663 = shalt.err (!%p660_p1)
}
  0x49   : > { %560 = dma.hbm_to_vmem [thread:$0]  (!%p868_p10), %s866_s9, 256, %s872_s29, %s874_s10, %s737_s13, %s737_s13, %s738_s14  }
  0x4a   : > { %p995_p0 = scmp.ne.s32.totalorder %s990_s24, 0 }
  0x4b   : > { %s908_s11 = sand.u32 (!%p995_p0), 1, %s726_s18   ;;  %p996_p5 = scmp.ne.s32.totalorder (!%p995_p0), %s988_s22, 0 }
  0x4c   : > { %197 = sbr.rel (%p995_p0) target bundleno = 356 (0x164), region = 36  ;;  %s449_s12 = sshll.u32 (!%p995_p0), %s908_s11, 4 }
  0x4d   : > { %s200_s15 = scalar_lea.sflag (!%p995_p0), [#allocation4], %s908_s11  ;;  %s914_s30 = scalar_lea.vmem (!%p995_p0), [#allocation3], %s449_s12 }
  0x53   : > { %709 = dma.done.wait (%p996_p5), %s200_s15, 256  }
  0x54   : > { %711 = vsyncadd (%p996_p5), %s200_s15, 4294967040  ;;  %p997_p10 = scmp.eq.s32.totalorder %s792_s0, 0 }
  0x56   : > { %713 = dma.done.wait (%p997_p10), [#allocation7], 2048   ;;  %p998_p2 = pmov %p997_p10 }
  0x57   : > { %v236_v0 = vld [vmem:[#allocation6] sm:$0xff]  ;;  %v237_v1 = vld [vmem:[#allocation6 + $0x8] sm:$0xff]  ;;  %v238_v2 = vld [vmem:[#allocation6 + $0x10] sm:$0xff]  ;;  %s327_s22 = sld [smem:[#allocation2]]  ;;  %s231_s14 = scalar_lea.vmem [#allocation8], %s449_s12 }
  0x58   : > { %715 = vsyncadd (%p998_p2), [#allocation7], 4294965248  ;;  %v513_v3 = vpack.c.bf16 %v237_v1, %v236_v0  ;;  %v239_v4 = vld [vmem:[#allocation6 + $0x18] sm:$0xff]  ;;  %v240_v6 = vld [vmem:[#allocation6 + $0x20] sm:$0xff]  ;;  %s358_s9 = sshll.u32 %s231_s14, 4  ;;  %s459_s29 = sshll.u32 %s792_s0, 8  ;;  %s932_s9 = int_to_ptr.vmem [resolvable:$true] %s358_s9 }
  0x59   : > { %v517_v5 = vpack.c.bf16 %v239_v4, %v238_v2  ;;  %v241_v7 = vld [vmem:[#allocation6 + $0x28] sm:$0xff]  ;;  %v234_v9 = vld [vmem:[%s914_s30] sm:$0xff]  ;;  %v243_v11 = vld [vmem:[#allocation6 + $0x38] sm:$0xff]  ;;  %s937_s5 = scalar_lea.hbm %s984_s4, %s459_s29  ;;  %s345_s6 = scalar_lea.sflag [#allocation5], %s908_s11 }
  0x5a   : > { %514 = vmatprep.subr.bf16.mxu0 %v513_v3  ;;  %v521_v8 = vpack.c.bf16 %v241_v7, %v240_v6  ;;  %v242_v10 = vld [vmem:[#allocation6 + $0x30] sm:$0xff]  ;;  %510 = vmatprep.mubr.f32.mxu0 %v234_v9  ;;  %v244_v13 = vld [vmem:[#allocation6 + $0x40] sm:$0xff]  ;;  %v245_v14 = vld [vmem:[#allocation6 + $0x48] sm:$0xff]  ;;  %s664_s27 = scalar_lea.vmem %s932_s9, 256  ;;  %s740_s0 = smov [#allocation8]  }
  0x5b   : > { %516 = vmatpush3.bf16.msra.mxu0 %v513_v3  ;;  %v525_v12 = vpack.c.bf16 %v243_v11, %v242_v10  ;;  %v529_v15 = vpack.c.bf16 %v245_v14, %v244_v13  ;;  %v246_v16 = vld [vmem:[#allocation6 + $0x50] sm:$0xff]  ;;  %v247_v17 = vld [vmem:[#allocation6 + $0x58] sm:$0xff]  ;;  %v248_v19 = vld [vmem:[#allocation6 + $0x60] sm:$0xff]  ;;  %p665_p4 = scmp.ne.s32.totalorder %s932_s9, %s664_s27  ;;  %s668_s7 = sshll.u32 %s740_s0, 4  ;;  %s669_s7 = int_to_ptr.vmem [resolvable:$false] %s668_s7 }
  0x5c   : > { %518 = vmatprep.subr.bf16.mxu0 %v517_v5  ;;  %v533_v18 = vpack.c.bf16 %v247_v17, %v246_v16  ;;  %v249_v20 = vld [vmem:[#allocation6 + $0x68] sm:$0xff]  ;;  %v250_v22 = vld [vmem:[#allocation6 + $0x70] sm:$0xff]  ;;  %v251_v23 = vld [vmem:[#allocation6 + $0x78] sm:$0xff]  ;;  %s670_s8 = scalar_lea.vmem %s669_s7, 512  ;;  %p671_p11 = scmp.lt.s32.totalorder %s932_s9, %s669_s7 }
  0x5d   : > { %v537_v21 = vpack.c.bf16 %v249_v20, %v248_v19  ;;  %v541_v24 = vpack.c.bf16 %v251_v23, %v250_v22  ;;  %v235_v25 = vld [vmem:[%s914_s30 + $0x8] sm:$0xff]  ;;  %v328_v26 = vstv %s327_s22  ;;  %v452_v28 = vld [vmem:[%s983_s3] ss:$0 sm:$0xff]  ;;  %p666_p6 = pnand %p665_p4, %p857_p12  ;;  %p672_p13 = scmp.lt.s32.totalorder %s670_s8, %s664_s27 }
  0x5f   : > { %520 = vmatpush3.bf16.msra.mxu0 %v517_v5  ;;  %p667_p8 = pneg %p666_p6  ;;  %p673_p3 = por %p672_p13, %p671_p11 }
  0x60   : > { %522 = vmatprep.subr.bf16.mxu0 %v521_v8 }
  0x61   : > { %p674_p7 = pnand %p673_p3, %p667_p8 }
  0x63   : > { %524 = vmatpush3.bf16.msra.mxu0 %v521_v8 }
  0x64   : > { %526 = vmatprep.subr.bf16.mxu0 %v525_v12 }
  0x67   : > { %528 = vmatpush3.bf16.msra.mxu0 %v525_v12 }
  0x68   : > { %530 = vmatprep.subr.bf16.mxu0 %v529_v15 }
  0x6b   : > { %532 = vmatpush3.bf16.msra.mxu0 %v529_v15 }
  0x6c   : > { %534 = vmatprep.subr.bf16.mxu0 %v533_v18 }
  0x6f   : > { %536 = vmatpush3.bf16.msra.mxu0 %v533_v18 }
  0x70   : > { %538 = vmatprep.subr.bf16.mxu0 %v537_v21 }
  0x73   : > { %540 = vmatpush3.bf16.msra.mxu0 %v537_v21 }
  0x74   : > { %542 = vmatprep.subr.bf16.mxu0 %v541_v24 }
  0x77   : > { %544 = vmatpush3.bf16.msra.mxu0 %v541_v24 }
  0x7a   : > { %511 = vmatmul.mubr.f32.vlgmr.msra.gmra.mrb[0].mxu0 %v235_v25 }
 0x14d   : > { %v512_v27 = vpop.f32.mrb[0].mxu0 }
 0x14e   : > { %v330_v29 = vmul.f32 %v512_v27, %v328_v26  ;;  %v318_v30 = vpop.f32.mrb[1].mxu0 }
 0x14f   : > { %v329_v31 = vmul.f32 %v328_v26, %v318_v30 }
 0x150   : > { %v339_v32 = vadd.f32 %v452_v28, %v330_v29 }
 0x151   : > { %v338_v33 = vadd.f32 %v452_v28, %v329_v31 }
 0x152   : > { %v341_v34 = vmax.f32 %v339_v32, 0.0 }
 0x153   : > { %v340_v35 = vmax.f32 %v338_v33, 0.0 }
 0x154   : > { %343 = vst [vmem:[%s231_s14 + $0x8] sm:$0xff] %v341_v34 }
 0x155   : > { %342 = vst [vmem:[%s231_s14] sm:$0xff] %v340_v35 }
 0x156   : > { %677 = shalt.err (!%p674_p7)
}
 0x157   : > { %s678_s26 = scalar_lea.hbm %s937_s5, 256  ;;  %s682_s30 = scalar_lea.hbm %s984_s4, 1024 }
 0x158   : > { %p679_p9 = scmp.ne.s32.totalorder %s937_s5, %s678_s26  ;;  %p683_p5 = scmp.lt.u32.totalorder %s937_s5, %s984_s4 }
 0x159   : > { %p684_p10 = scmp.lt.u32.totalorder %s682_s30, %s678_s26  ;;  %p686_p4 = scmp.lt.u32.totalorder %s678_s26, %s937_s5 }
 0x15a   : > { %p680_p1 = pnand %p679_p9, %p857_p12 }
 0x15b   : > { %p685_p2 = por %p684_p10, %p683_p5 }
 0x15c   : > { %p681_p0 = pneg %p680_p1 }
 0x15d   : > { %p687_p6 = por %p686_p4, %p685_p2 }
 0x15f   : > { %p688_p8 = pnand %p687_p6, %p681_p0 }
 0x161   : > { %691 = shalt.err (!%p688_p8)
}
 0x162   : > { %s741_s13 = smov 128   ;;  %s742_s14 = smov 8  }
 0x163   : > { %551 = dma.vmem_to_hbm [thread:$0]  (%p857_p12), %s932_s9, 256, %s937_s5, %s345_s6, %s741_s13, %s741_s13, %s742_s14  }
 0x164 PF: > { %p568_p11 = scmp.ge.s32.totalorder %s734_s20, 2  ;;  %s373_s29 = sand.u32 1, %s722_s17  }
 0x165   : > { %p999_p13 = scmp.ne.s32.totalorder %s989_s23, 0  ;;  %s374_s10 = scalar_lea.sflag [#allocation5], %s373_s29 }
 0x167   : > { %p562_p3 = pnand %p568_p11, %p999_p13 }
 0x169   : > { %717 = dma.done.wait (!%p562_p3), %s374_s10, 256  }
 0x16a   : > { %719 = vsyncadd (!%p562_p3), %s374_s10, 4294967040  ;;  %p19_p7 = scmp.ge.s32.totalorder %s824_s28, 6   ;;  %s1000_s17 = smov %s726_s18 }
 0x16b   : > { %s1001_s18 = smov %s730_s19  ;;  %s1002_s19 = smov %s853_s21 }
 0x16c   : > { %s1003_s20 = smov %s824_s28  ;;  %21 = sbr.rel (!%p19_p7) target bundleno = 8 (0x8), region = 85 }
 0x173   :  { %379 = vsyncpa [#allocation4], 1 }
 0x174   :  { %381 = vsyncpa [#allocation4 + $0x1], 1 }
 0x175   :  { %382 = vsyncpa [#allocation7], 1 }
 0x176   :  { %383 = vsyncpa [#allocation5], 1 }
 0x177   :  { %385 = vsyncpa [#allocation5 + $0x1], 1 }

</bundles_post_ra>
